<compile_context>
chip_gen: v7x
topology: tpu7x:2x2x1
jax: 0.10.0
libtpu: 0.0.40
codegen_flags: <defaults>
</compile_context>

<pallas_src>
import jax
import jax.numpy as jnp
from jax.experimental import pallas as pl
from jax.experimental.pallas import tpu as pltpu

VOCAB = 256     # word_emb_vocab_size default
EMB_DIM = 52    # word_emb_dim default
# dropout_prob default = 0  -> no dropout layer
# nonlinear default = 'ReLU'

_SUBLANE = 8
_MAX_TB = 2048  # row-tile cap (multiple of 8); ~9-10 MiB VMEM at this size


def embed_relu_kernel(ids_ref, table_ref, out_ref):
    # ids_ref:   (TB, 1)  int32 token ids for this tile
    # table_ref: (V, D)   f32 embedding table (full array, stays VMEM-resident)
    # out_ref:   (TB, D)  f32 output block, unpadded (D == full last dim)
    ids = ids_ref[...]                                       # (TB, 1)
    tb = ids.shape[0]
    vocab = table_ref.shape[0]
    col = jax.lax.broadcasted_iota(jnp.int32, (tb, vocab), 1)
    onehot = (col == ids).astype(table_ref.dtype)            # (TB, V) exact 0/1 rows
    emb = jnp.dot(onehot, table_ref[...],
                  preferred_element_type=jnp.float32,
                  precision=jax.lax.Precision.HIGHEST)       # (TB, D) gather via MXU
    out_ref[...] = jnp.maximum(emb, 0.0).astype(out_ref.dtype)   # ReLU


def word_embedding_forward(inp, table, tb=None):
    """inp: [B, L] int32 token ids; table: [V, D] float32 -> [B, L, D] float32."""
    B, L = inp.shape
    V, D = table.shape
    N = B * L

    # Row tile: single step for small problems, otherwise 2048-row chunks.
    if tb is None:
        tb = N if N <= _MAX_TB else _MAX_TB
    tb = max(_SUBLANE, ((tb + _SUBLANE - 1) // _SUBLANE) * _SUBLANE)

    # No row padding: ragged last block is handled by Pallas (masked writeback;
    # garbage ids in the tail only feed the equality compare).
    ids = inp.reshape(N, 1).astype(jnp.int32)

    grid = (pl.cdiv(N, tb),)
    # Only shard across TensorCores (v7x) when there is real work to split.
    semantics = ("parallel",) if grid[0] > 1 else ("arbitrary",)

    cost = pl.CostEstimate(
        flops=2 * N * V * D,
        transcendentals=0,
        bytes_accessed=N * 4 + V * D * 4 + N * D * 4,
    )

    out = pl.pallas_call(
        embed_relu_kernel,
        out_shape=jax.ShapeDtypeStruct((N, D), table.dtype),
        grid_spec=pltpu.PrefetchScalarGridSpec(
            num_scalar_prefetch=0,
            grid=grid,
            in_specs=[
                pl.BlockSpec((tb, 1), lambda i: (i, 0)),   # token-id tile
                pl.BlockSpec((V, D), lambda i: (0, 0)),    # full table, resident
            ],
            out_specs=pl.BlockSpec((tb, D), lambda i: (i, 0)),
        ),
        compiler_params=pltpu.CompilerParams(
            dimension_semantics=semantics,
            vmem_limit_bytes=32 * 1024 * 1024,
        ),
        cost_estimate=cost,
    )(ids, table)

    return out.reshape(B, L, D)


if __name__ == "__main__":
    key = jax.random.PRNGKey(0)
    k_tab, k_ids, k_ids2, k_ids3 = jax.random.split(key, 4)

    # Deterministic synthetic parameters (nn.Embedding(VOCAB, EMB_DIM) weight).
    table = jax.random.normal(k_tab, (VOCAB, EMB_DIM), dtype=jnp.float32)

    # TODO(synk): nn.Embedding raises on out-of-range ids; here ids >= VOCAB
    # silently produce an all-zero embedding (one-hot row is all zeros).

    # Small case matching the module's forward: [B, L] -> [B, L, 52].
    B, L = 2, 8
    inp = jax.random.randint(k_ids, (B, L), 0, VOCAB, dtype=jnp.int32)
    out = jax.block_until_ready(word_embedding_forward(inp, table))
    ref = jnp.maximum(table[inp], 0.0)
    assert out.shape == (B, L, EMB_DIM)
    assert jnp.allclose(out, ref, atol=1e-5), "mismatch vs reference (small)"

    # Medium case: single grid step, unpadded D=52 output.
    B2, L2 = 4, 200
    inp2 = jax.random.randint(k_ids2, (B2, L2), 0, VOCAB, dtype=jnp.int32)
    out2 = jax.block_until_ready(word_embedding_forward(inp2, table))
    ref2 = jnp.maximum(table[inp2], 0.0)
    assert out2.shape == (B2, L2, EMB_DIM)
    assert jnp.allclose(out2, ref2, atol=1e-5), "mismatch vs reference (medium)"

    # Larger case: N = 2100 > 2048 -> multi-step "parallel" grid with a ragged
    # (masked) last block, exercising the no-padding path.
    B3, L3 = 3, 700
    inp3 = jax.random.randint(k_ids3, (B3, L3), 0, VOCAB, dtype=jnp.int32)
    out3 = jax.block_until_ready(word_embedding_forward(inp3, table))
    ref3 = jnp.maximum(table[inp3], 0.0)
    assert out3.shape == (B3, L3, EMB_DIM)
    assert jnp.allclose(out3, ref3, atol=1e-5), "mismatch vs reference (ragged)"

    print("KERNEL_OK")
</pallas_src>

<mosaic_0001>
module attributes {stable_mosaic.version = 11 : i64} {
  func.func @embed_relu_kernel(%arg0: i32, %arg1: memref<16x1xi32, #tpu.memory_space<vmem>>, %arg2: memref<256x52xf32, #tpu.memory_space<vmem>>, %arg3: memref<16x52xf32, #tpu.memory_space<vmem>>) attributes {dimension_semantics = [#tpu.dimension_semantics<arbitrary>], iteration_bounds = array<i64: 1>, scalar_prefetch = 0 : i64, scratch_operands = 0 : i64, tpu.core_type = #tpu.core_type<tc>, window_params = [{transform_indices = @transform_0, window_bounds = array<i64: 16, 1>}, {pipeline_mode = #tpu.pipeline_mode<synchronous>, transform_indices = @transform_1, window_bounds = array<i64: 256, 52>}, {transform_indices = @transform_2, window_bounds = array<i64: 16, 52>}]} {
    %c0 = arith.constant 0 : index
    %c0_0 = arith.constant 0 : index
    %0 = vector.load %arg1[%c0, %c0_0] : memref<16x1xi32, #tpu.memory_space<vmem>>, vector<16x1xi32>
    %1 = tpu.iota {dimensions = array<i32: 1>} : vector<16x256xi32>
    %2 = vector.broadcast %0 : vector<16x1xi32> to vector<16x256xi32>
    %3 = arith.cmpi eq, %1, %2 : vector<16x256xi32>
    %4 = arith.extui %3 : vector<16x256xi1> to vector<16x256xi32>
    %5 = arith.sitofp %4 : vector<16x256xi32> to vector<16x256xf32>
    %c0_1 = arith.constant 0 : index
    %c0_2 = arith.constant 0 : index
    %6 = vector.load %arg2[%c0_1, %c0_2] : memref<256x52xf32, #tpu.memory_space<vmem>>, vector<256x52xf32>
    %cst = arith.constant dense<0.000000e+00> : vector<16x52xf32>
    %7 = tpu.matmul %5, %6, %cst {dimension_numbers = #tpu.dot_dimension_numbers<[1], [0], [0], [1], [0, 0, 1, 1], [], []>, precision = #tpu.contract_precision<fp32>} : vector<16x256xf32>, vector<256x52xf32>, vector<16x52xf32> -> vector<16x52xf32>
    %cst_3 = arith.constant 0.000000e+00 : f32
    %8 = vector.broadcast %cst_3 : f32 to vector<16x52xf32>
    %9 = arith.maximumf %7, %8 : vector<16x52xf32>
    %c0_4 = arith.constant 0 : index
    %c0_5 = arith.constant 0 : index
    %10 = vector.load %arg3[%c0_4, %c0_5] : memref<16x52xf32, #tpu.memory_space<vmem>>, vector<16x52xf32>
    tpu.vector_store %arg3[%c0_4, %c0_5], %9 {strides = array<i32>} : memref<16x52xf32, #tpu.memory_space<vmem>>, vector<16x52xf32>,
    return
  }
  func.func @transform_0(%arg0: i32) -> (i32, i32) {
    %c0_i32 = arith.constant 0 : i32
    %c0_i32_0 = arith.constant 0 : i32
    return %arg0, %c0_i32 : i32, i32
  }
  func.func @transform_1(%arg0: i32) -> (i32, i32) {
    %c0_i32 = arith.constant 0 : i32
    %c0_i32_0 = arith.constant 0 : i32
    %c0_i32_1 = arith.constant 0 : i32
    return %c0_i32, %c0_i32_0 : i32, i32
  }
  func.func @transform_2(%arg0: i32) -> (i32, i32) {
    %c0_i32 = arith.constant 0 : i32
    %c0_i32_0 = arith.constant 0 : i32
    return %arg0, %c0_i32 : i32, i32
  }
}

</mosaic_0001>

<bundles_post_ra>
// kernel: tpu_custom_call.1
= control target key start
LH: loop header
LB: loop body
LE: loop exit
PB: predicated region body
PF: predicated region fallthrough
CT: control target
= control target key end

     0   :  { %v1473_v2 = vmov 0   ;;  %s2343_s0 = inlined_call_operand.vmem [shape: s32[16,1], index: 0, kind: input, shape index: {}]   ;;  %s2344_s1 = inlined_call_operand.vmem [shape: f32[256,52], index: 1, kind: input, shape index: {}]   ;;  %s2345_s2 = inlined_call_operand.hbm [shape: f32[16,52], index: 2, kind: output, shape index: {}]  }
   0x1   :  { %v12_v0 = vld [vmem:[%s2343_s0] sm:$0xff]  ;;  %1448 = vset.pattern.permute.xlu0 %v1473_v2  ;;  %v1505_v3 = vld [vmem:[%s2344_s1 + $0x88] sm:$0xff]  ;;  %v1524_v10 = vld [vmem:[%s2344_s1 + $0x90] sm:$0xff] }
   0x2   :  { %v1500_v1 = vld [vmem:[%s2344_s1 + $0x80] sm:$0xff]  ;;  %v1516_v6 = vld [vmem:[%s2344_s1 + $0x8] sm:$0xff]  ;;  %18 = vperm.xlu0 %1448, %v12_v0   ;;  %v119_v7 = vand.u32 4294901760, %v1505_v3  ;;  %v1529_v11 = vld [vmem:[%s2344_s1 + $0x98] sm:$0xff]  ;;  %v122_v15 = vand.u32 4294901760, %v1524_v10 }
   0x3   :  { %v116_v4 = vand.u32 4294901760, %v1500_v1  ;;  %v1511_v5 = vld [vmem:[%s2344_s1] sm:$0xff]  ;;  %v71_v9 = vand.u32 4294901760, %v1516_v6  ;;  %v1534_v12 = vld [vmem:[%s2344_s1 + $0x10] sm:$0xff]  ;;  %v13_v13 = vld [vmem:[%s2343_s0 + $0x8] sm:$0xff]  ;;  %v125_v16 = vand.u32 4294901760, %v1529_v11 }
   0x4   :  { %v68_v8 = vand.u32 4294901760, %v1511_v5  ;;  %v1547_v17 = vld [vmem:[%s2344_s1 + $0x18] sm:$0xff]  ;;  %v74_v18 = vand.u32 4294901760, %v1534_v12  ;;  %v1551_v19 = vsub.f32 %v1505_v3, %v119_v7  ;;  %v1568_v24 = vsub.f32 %v1524_v10, %v122_v15  ;;  %v1607_v39 = vld [vmem:[%s2344_s1 + $0xa0] sm:$0xff]  ;;  %v1621_v44 = vld [vmem:[%s2344_s1 + $0xa8] sm:$0xff] }
   0x5   :  { %v1540_v14 = vsub.f32 %v1500_v1, %v116_v4  ;;  %v1561_v21 = vsub.f32 %v1516_v6, %v71_v9  ;;  %v77_v22 = vand.u32 4294901760, %v1547_v17  ;;  %v1573_v25 = vsub.f32 %v1529_v11, %v125_v16  ;;  %v1629_v49 = vld [vmem:[%s2344_s1 + $0x20] sm:$0xff]  ;;  %v1635_v54 = vld [vmem:[%s2344_s1 + $0x28] sm:$0xff]  ;;  %v1641_v59 = vld [vmem:[%s2344_s1 + $0xb0] sm:$0xff] }
   0x6   :  { %v1556_v20 = vsub.f32 %v1511_v5, %v68_v8  ;;  %v1578_v26 = vsub.f32 %v1534_v12, %v74_v18  ;;  %21 = vperm.xlu0 %1448, %v13_v13   ;;  %v2365_v27 = vand.u32 4294901760, %v1551_v19  ;;  %v2359_v32 = vand.u32 4294901760, %v1568_v24  ;;  %v1646_v60 = vld [vmem:[%s2344_s1 + $0xb8] sm:$0xff] }
   0x7   :  { %v2366_v23 = vand.u32 4294901760, %v1540_v14  ;;  %v2360_v29 = vand.u32 4294901760, %v1561_v21  ;;  %v1586_v30 = vsub.f32 %v1547_v17, %v77_v22  ;;  %v2358_v33 = vand.u32 4294901760, %v1573_v25 }
   0x8   :  { %v2364_v28 = vand.u32 4294901760, %v1556_v20  ;;  %v2357_v34 = vand.u32 4294901760, %v1578_v26  ;;  %v317_v35 = vsub.f32 %v1551_v19, %v2365_v27  ;;  %v324_v41 = vsub.f32 %v1568_v24, %v2359_v32 }
   0x9   :  { %v310_v31 = vsub.f32 %v1540_v14, %v2366_v23  ;;  %v205_v37 = vsub.f32 %v1561_v21, %v2360_v29  ;;  %v2354_v38 = vand.u32 4294901760, %v1586_v30  ;;  %v331_v42 = vsub.f32 %v1573_v25, %v2358_v33 }
   0xa   :  { %v198_v36 = vsub.f32 %v1556_v20, %v2364_v28  ;;  %v212_v43 = vsub.f32 %v1578_v26, %v2357_v34  ;;  %v318_v45 = vand.u32 4294901760, %v317_v35  ;;  %v325_v50 = vand.u32 4294901760, %v324_v41 }
   0xb   :  { %v311_v40 = vand.u32 4294901760, %v310_v31  ;;  %v206_v47 = vand.u32 4294901760, %v205_v37  ;;  %v219_v48 = vsub.f32 %v1586_v30, %v2354_v38  ;;  %v332_v51 = vand.u32 4294901760, %v331_v42 }
   0xc   :  { %v199_v46 = vand.u32 4294901760, %v198_v36  ;;  %v213_v52 = vand.u32 4294901760, %v212_v43  ;;  %v128_v53 = vand.u32 4294901760, %v1607_v39  ;;  %v131_v58 = vand.u32 4294901760, %v1621_v44 }
   0xd   :  { %v1282_v55 = vpack.c.bf16 %v318_v45, %v311_v40  ;;  %v220_v57 = vand.u32 4294901760, %v219_v48 }
   0xe   :  { %v1284_v56 = vpack.c.bf16 %v206_v47, %v199_v46 }
   0xf   :  { %7 = vsyncpa [#allocation3], 0  ;;  %v1286_v61 = vpack.c.bf16 %v332_v51, %v325_v50  ;;  %v1651_v62 = vsub.f32 %v1607_v39, %v128_v53  ;;  %v1653_v63 = vpack.c.bf16 %v119_v7, %v116_v4  ;;  %v80_v0 = vand.u32 4294901760, %v1629_v49  ;;  %v1659_v1 = vld [vmem:[%s2344_s1 + $0x30] sm:$0xff]  ;;  %1283 = vmatprep.subr.bf16.mxu1 %v1282_v55  ;;  %v1685_v5 = vld [vmem:[%s2344_s1 + $0x38] sm:$0xff] }
  0x10   :  { %v1288_v2 = vpack.c.bf16 %v220_v57, %v213_v52  ;;  %v1664_v3 = vsub.f32 %v1621_v44, %v131_v58  ;;  %v83_v13 = vand.u32 4294901760, %v1635_v54  ;;  %v1671_v4 = vpack.c.bf16 %v71_v9, %v68_v8  ;;  %1285 = vmatpush3.bf16.msra.mxu1 %v1284_v56  ;;  %v1743_v56 = vld [vmem:[%s2344_s1 + $0xc0] sm:$0xff]  ;;  %v1748_v57 = vld [vmem:[%s2344_s1 + $0xc8] sm:$0xff] }
  0x11   :  { %v2351_v7 = vand.u32 4294901760, %v1651_v62  ;;  %1251 = vmatprep.subr.bf16.mxu0 %v1653_v63  ;;  %v1678_v31 = vsub.f32 %v1629_v49, %v80_v0  ;;  %v134_v35 = vand.u32 4294901760, %v1641_v59  ;;  %v137_v36 = vand.u32 4294901760, %v1646_v60  ;;  %1287 = vmatprep.subr.bf16.mxu1 %v1286_v61  ;;  %v1829_v49 = vld [vmem:[%s2344_s1 + $0x50] sm:$0xff]  ;;  %v1912_v23 = vld [vmem:[%s2344_s1 + $0x60] sm:$0xff] }
  0x12   :  { %v2348_v6 = vand.u32 4294901760, %v1664_v3  ;;  %v1691_v8 = vsub.f32 %v1635_v54, %v83_v13  ;;  %1253 = vmatpush3.bf16.msra.mxu0 %v1671_v4  ;;  %v1698_v9 = vpack.c.bf16 %v125_v16, %v122_v15  ;;  %v86_v37 = vand.u32 4294901760, %v1659_v1  ;;  %v1834_v54 = vld [vmem:[%s2344_s1 + $0x58] sm:$0xff] }
  0x13   :  { %v338_v40 = vsub.f32 %v1651_v62, %v2351_v7  ;;  %v2347_v41 = vand.u32 4294901760, %v1678_v31  ;;  %v1708_v42 = vsub.f32 %v1641_v59, %v134_v35  ;;  %v1713_v10 = vsub.f32 %v1646_v60, %v137_v36 }
  0x14   :  { %v345_v11 = vsub.f32 %v1664_v3, %v2348_v6  ;;  %v2346_v15 = vand.u32 4294901760, %v1691_v8  ;;  %1255 = vmatprep.subr.bf16.mxu0 %v1698_v9  ;;  %v89_v16 = vand.u32 4294901760, %v1685_v5  ;;  %v1724_v43 = vsub.f32 %v1659_v1, %v86_v37  ;;  %1289 = vmatpush3.bf16.msra.mxu1 %v1288_v2 }
  0x15   :  { %v339_v45 = vand.u32 4294901760, %v338_v40  ;;  %v226_v46 = vsub.f32 %v1678_v31, %v2347_v41  ;;  %v2349_v47 = vand.u32 4294901760, %v1708_v42  ;;  %v2350_v48 = vand.u32 4294901760, %v1713_v10 }
  0x16   :  { %v346_v50 = vand.u32 4294901760, %v345_v11  ;;  %v233_v51 = vsub.f32 %v1691_v8, %v2346_v15  ;;  %v2352_v52 = vand.u32 4294901760, %v1724_v43  ;;  %v1738_v55 = vsub.f32 %v1685_v5, %v89_v16 }
  0x17   :  { %v227_v61 = vand.u32 4294901760, %v226_v46  ;;  %v352_v2 = vsub.f32 %v1708_v42, %v2349_v47  ;;  %v359_v40 = vsub.f32 %v1713_v10, %v2350_v48  ;;  %v1760_v11 = vpack.c.bf16 %v77_v22, %v74_v18  ;;  %v1769_v47 = vld [vmem:[%s2344_s1 + $0x40] sm:$0xff]  ;;  %v1777_v18 = vld [vmem:[%s2344_s1 + $0x48] sm:$0xff]  ;;  %v1782_v22 = vld [vmem:[%s2344_s1 + $0xd0] sm:$0xff] }
  0x18   :  { %v1290_v15 = vpack.c.bf16 %v346_v50, %v339_v45  ;;  %v234_v41 = vand.u32 4294901760, %v233_v51  ;;  %v240_v46 = vsub.f32 %v1724_v43, %v2352_v52  ;;  %v2353_v6 = vand.u32 4294901760, %v1738_v55 }
  0x19   :  { %v353_v48 = vand.u32 4294901760, %v352_v2  ;;  %v360_v7 = vand.u32 4294901760, %v359_v40  ;;  %1257 = vmatpush3.bf16.msra.mxu0 %v1760_v11  ;;  %v140_v12 = vand.u32 4294901760, %v1743_v56  ;;  %v143_v17 = vand.u32 4294901760, %v1748_v57  ;;  %v1796_v40 = vld [vmem:[%s2344_s1 + $0xd8] sm:$0xff] }
  0x1a   :  { %1291 = vmatprep.subr.bf16.mxu1 %v1290_v15  ;;  %v1292_v45 = vpack.c.bf16 %v234_v41, %v227_v61  ;;  %v241_v50 = vand.u32 4294901760, %v240_v46  ;;  %v247_v51 = vsub.f32 %v1738_v55, %v2353_v6  ;;  %v1791_v2 = vpack.c.bf16 %v131_v58, %v128_v53 }
  0x1b   :  { %v1294_v52 = vpack.c.bf16 %v360_v7, %v353_v48  ;;  %v1801_v41 = vsub.f32 %v1743_v56, %v140_v12  ;;  %v1806_v15 = vsub.f32 %v1748_v57, %v143_v17  ;;  %v92_v39 = vand.u32 4294901760, %v1769_v47 }
  0x1c   :  { %1293 = vmatpush3.bf16.msra.mxu1 %v1292_v45  ;;  %v248_v44 = vand.u32 4294901760, %v247_v51  ;;  %1259 = vmatprep.subr.bf16.mxu0 %v1791_v2  ;;  %v95_v53 = vand.u32 4294901760, %v1777_v18  ;;  %v1815_v58 = vpack.c.bf16 %v83_v13, %v80_v0  ;;  %v146_v7 = vand.u32 4294901760, %v1782_v22 }
  0x1d   :  { %1295 = vmatprep.subr.bf16.mxu1 %v1294_v52  ;;  %v2355_v48 = vand.u32 4294901760, %v1801_v41  ;;  %v2356_v61 = vand.u32 4294901760, %v1806_v15  ;;  %v1823_v46 = vsub.f32 %v1769_v47, %v92_v39  ;;  %v149_v45 = vand.u32 4294901760, %v1796_v40  ;;  %v50_v47 = vld [vmem:[%s2344_s1 + $0x78] sm:$0xff] }
  0x1e   :  { %v1296_v0 = vpack.c.bf16 %v248_v44, %v241_v50  ;;  %v1839_v13 = vsub.f32 %v1777_v18, %v95_v53  ;;  %1261 = vmatpush3.bf16.msra.mxu0 %v1815_v58  ;;  %v1845_v52 = vsub.f32 %v1782_v22, %v146_v7  ;;  %v1851_v51 = vpack.c.bf16 %v137_v36, %v134_v35 }
  0x1f   :  { %v366_v50 = vsub.f32 %v1801_v41, %v2355_v48  ;;  %v373_v44 = vsub.f32 %v1806_v15, %v2356_v61  ;;  %v2363_v6 = vand.u32 4294901760, %v1823_v46  ;;  %v1863_v38 = vsub.f32 %v1796_v40, %v149_v45 }
  0x20   :  { %1297 = vmatpush3.bf16.msra.mxu1 %v1296_v0  ;;  %v2361_v59 = vand.u32 4294901760, %v1839_v13  ;;  %v2362_v60 = vand.u32 4294901760, %v1845_v52  ;;  %1263 = vmatprep.subr.bf16.mxu0 %v1851_v51  ;;  %v2368_v35 = vand.u32 4294901760, %v1829_v49  ;;  %v2367_v36 = vand.u32 4294901760, %v1834_v54 }
  0x21   :  { %v367_v48 = vand.u32 4294901760, %v366_v50  ;;  %v374_v61 = vand.u32 4294901760, %v373_v44  ;;  %v254_v34 = vsub.f32 %v1823_v46, %v2363_v6  ;;  %v2369_v33 = vand.u32 4294901760, %v1863_v38  ;;  %v1893_v44 = vld [vmem:[%s2344_s1 + $0xe0] sm:$0xff] }
  0x22   :  { %v261_v0 = vsub.f32 %v1839_v13, %v2361_v59  ;;  %v380_v32 = vsub.f32 %v1845_v52, %v2362_v60  ;;  %v1883_v29 = vsub.f32 %v1829_v49, %v2368_v35  ;;  %v1888_v50 = vsub.f32 %v1834_v54, %v2367_v36  ;;  %v1898_v59 = vld [vmem:[%s2344_s1 + $0xe8] sm:$0xff] }
  0x23   :  { %v1298_v60 = vpack.c.bf16 %v374_v61, %v367_v48  ;;  %v255_v6 = vand.u32 4294901760, %v254_v34  ;;  %v387_v28 = vsub.f32 %v1863_v38, %v2369_v33  ;;  %v1907_v27 = vpack.c.bf16 %v89_v16, %v86_v37  ;;  %v1919_v61 = vld [vmem:[%s2344_s1 + $0x68] sm:$0xff]  ;;  %v65_v33 = vld [vmem:[%s2344_s1 + $0xf0] sm:$0xff] }
  0x24   :  { %v262_v36 = vand.u32 4294901760, %v261_v0  ;;  %v381_v35 = vand.u32 4294901760, %v380_v32  ;;  %v2371_v48 = vand.u32 4294901760, %v1883_v29  ;;  %v2370_v34 = vand.u32 4294901760, %v1888_v50 }
  0x25   :  { %2392 = vst [vmem:[#allocation5_spill] sm:$0xff] %v1907_v27  ;;  %1299 = vmatprep.subr.bf16.mxu1 %v1298_v60  ;;  %v388_v1 = vand.u32 4294901760, %v387_v28  ;;  %1265 = vmatpush3.bf16.msra.mxu0 %v1907_v27  ;;  %v152_v5 = vand.u32 4294901760, %v1893_v44  ;;  %v155_v37 = vand.u32 4294901760, %v1898_v59  ;;  %v1928_v32 = vpack.c.bf16 %v143_v17, %v140_v12  ;;  %v66_v17 = vld [vmem:[%s2344_s1 + $0xf8] sm:$0xff] }
  0x26   :  { %v1300_v16 = vpack.c.bf16 %v262_v36, %v255_v6  ;;  %v268_v0 = vsub.f32 %v1883_v29, %v2371_v48  ;;  %v275_v28 = vsub.f32 %v1888_v50, %v2370_v34  ;;  %v104_v60 = vand.u32 4294901760, %v1912_v23 }
  0x27   :  { %2393 = vst [vmem:[#allocation6_spill] sm:$0xff] %v1928_v32  ;;  %v1302_v56 = vpack.c.bf16 %v388_v1, %v381_v35  ;;  %v1941_v57 = vsub.f32 %v1893_v44, %v152_v5  ;;  %v1944_v6 = vsub.f32 %v1898_v59, %v155_v37  ;;  %1267 = vmatprep.subr.bf16.mxu0 %v1928_v32  ;;  %v107_v12 = vand.u32 4294901760, %v1919_v61 }
  0x28   :  { %1301 = vmatpush3.bf16.msra.mxu1 %v1300_v16  ;;  %v269_v36 = vand.u32 4294901760, %v268_v0  ;;  %v276_v34 = vand.u32 4294901760, %v275_v28  ;;  %v1952_v48 = vsub.f32 %v1912_v23, %v104_v60  ;;  %v1958_v59 = vpack.c.bf16 %v95_v53, %v92_v39  ;;  %v49_v23 = vld [vmem:[%s2344_s1 + $0x70] sm:$0xff]  ;;  %s1476_s1 = smov [#allocation2]  }
  0x29   :  { %1303 = vmatprep.subr.bf16.mxu1 %v1302_v56  ;;  %v2372_v35 = vand.u32 4294901760, %v1941_v57  ;;  %v2373_v44 = vand.u32 4294901760, %v1944_v6  ;;  %v1963_v1 = vsub.f32 %v1919_v61, %v107_v12  ;;  %v158_v16 = vand.u32 4294901760, %v65_v33  ;;  %s995_s19 = sshll.u32 %s1476_s1, 4  ;;  %s996_s19 = int_to_ptr.vmem [resolvable:$true] %s995_s19 }
  0x2a   :  { %2394 = vst [vmem:[#allocation7_spill] sm:$0xff] %v1958_v59  ;;  %v1304_v18 = vpack.c.bf16 %v276_v34, %v269_v36  ;;  %v2378_v39 = vand.u32 4294901760, %v1952_v48  ;;  %1269 = vmatpush3.bf16.msra.mxu0 %v1958_v59  ;;  %v161_v53 = vand.u32 4294901760, %v66_v17  ;;  %v1977_v61 = vpack.c.bf16 %v149_v45, %v146_v7  ;;  %s1449_s20 = scalar_lea.vmem %s996_s19, 256  ;;  %p1454_p1 = scmp.lt.s32.totalorder %s996_s19, %s996_s19 }
  0x2b   :  { %v394_v0 = vsub.f32 %v1941_v57, %v2372_v35  ;;  %v401_v28 = vsub.f32 %v1944_v6, %v2373_v44  ;;  %v2383_v34 = vand.u32 4294901760, %v1963_v1  ;;  %v1986_v56 = vsub.f32 %v65_v33, %v158_v16  ;;  %p1450_p0 = scmp.ne.s32.totalorder %s996_s19, %s1449_s20  ;;  %p1455_p2 = scmp.lt.s32.totalorder %s1449_s20, %s1449_s20 }
  0x2c   :  { %2395 = vst [vmem:[#allocation8_spill] sm:$0xff] %v1977_v61  ;;  %1305 = vmatpush3.bf16.msra.mxu1 %v1304_v18  ;;  %v282_v22 = vsub.f32 %v1952_v48, %v2378_v39  ;;  %v1991_v40 = vsub.f32 %v66_v17, %v161_v53  ;;  %1271 = vmatprep.subr.bf16.mxu0 %v1977_v61  ;;  %v110_v7 = vand.u32 4294901760, %v49_v23  ;;  %v113_v45 = vand.u32 4294901760, %v50_v47 }
  0x2d   :  { %v395_v36 = vand.u32 4294901760, %v394_v0  ;;  %v402_v35 = vand.u32 4294901760, %v401_v28  ;;  %v289_v44 = vsub.f32 %v1963_v1, %v2383_v34  ;;  %v2385_v33 = vand.u32 4294901760, %v1986_v56  ;;  %p1456_p3 = por %p1455_p2, %p1454_p1 }
  0x2e   :  { %v283_v59 = vand.u32 4294901760, %v282_v22  ;;  %v2384_v18 = vand.u32 4294901760, %v1991_v40  ;;  %v1999_v32 = vsub.f32 %v49_v23, %v110_v7  ;;  %v2001_v39 = vsub.f32 %v50_v47, %v113_v45 }
  0x2f   :  { %v1306_v17 = vpack.c.bf16 %v402_v35, %v395_v36  ;;  %v290_v27 = vand.u32 4294901760, %v289_v44  ;;  %v408_v0 = vsub.f32 %v1986_v56, %v2385_v33  ;;  %v2396_v28 = vand.u32 4294901760, %v1829_v49  ;;  %p1457_p4 = pnand %p1456_p3, %p1450_p0 }
  0x30   :  { %v2397_v61 = vand.u32 4294901760, %v1834_v54  ;;  %v415_v22 = vsub.f32 %v1991_v40, %v2384_v18  ;;  %v295_v23 = vand.u32 4294901760, %v1999_v32  ;;  %v302_v47 = vand.u32 4294901760, %v2001_v39 }
  0x31   :  { %1307 = vmatprep.subr.bf16.mxu1 %v1306_v17  ;;  %v1308_v35 = vpack.c.bf16 %v290_v27, %v283_v59  ;;  %v409_v44 = vand.u32 4294901760, %v408_v0  ;;  %v2018_v36 = vpack.c.bf16 %v155_v37, %v152_v5  ;;  %v2025_v18 = vpack.c.bf16 %v161_v53, %v158_v16 }
  0x32   :  { %v2010_v34 = vpack.c.bf16 %v2397_v61, %v2396_v28  ;;  %v416_v49 = vand.u32 4294901760, %v415_v22  ;;  %v296_v54 = vsub.f32 %v1999_v32, %v295_v23  ;;  %v303_v61 = vsub.f32 %v2001_v39, %v302_v47 }
  0x33   :  { %1309 = vmatpush3.bf16.msra.mxu1 %v1308_v35  ;;  %v2023_v28 = vpack.c.bf16 %v107_v12, %v104_v60  ;;  %v2027_v33 = vpack.c.bf16 %v113_v45, %v110_v7  ;;  %v1314_v5 = vpack.c.bf16 %v1551_v19, %v1540_v14  ;;  %v2403_v35 = vand.u32 4294901760, %v1573_v25 }
  0x34   :  { %1273 = vmatpush3.bf16.msra.mxu0 %v2010_v34  ;;  %v1310_v27 = vpack.c.bf16 %v416_v49, %v409_v44  ;;  %v297_v59 = vand.u32 4294901760, %v296_v54  ;;  %v304_v17 = vand.u32 4294901760, %v303_v61  ;;  %v2400_v54 = vand.u32 4294901760, %v1556_v20 }
  0x35   :  { %1275 = vmatprep.subr.bf16.mxu0 %v2018_v36  ;;  %v2401_v61 = vand.u32 4294901760, %v1561_v21  ;;  %vm987_vm4 = vcmask 424960  }
  0x36   :  { %1311 = vmatprep.subr.bf16.mxu1 %v1310_v27  ;;  %v1312_v16 = vpack.c.bf16 %v304_v17, %v297_v59  ;;  %v2398_v17 = vand.u32 4294901760, %v1540_v14  ;;  %v2402_v27 = vand.u32 4294901760, %v1568_v24  ;;  %v2404_v59 = vand.u32 4294901760, %v1578_v26 }
  0x37   :  { %v2075_v44 = vpack.c.bf16 %v2401_v61, %v2400_v54  ;;  %v2405_v14 = vand.u32 4294901760, %v1586_v30  ;;  %v2411_v54 = vand.u32 4294901760, %v1691_v8 }
  0x38   :  { %1277 = vmatpush3.bf16.msra.mxu0 %v2023_v28  ;;  %1313 = vmatpush3.bf16.msra.mxu1 %v1312_v16  ;;  %v2399_v16 = vand.u32 4294901760, %v1551_v19  ;;  %v2081_v22 = vpack.c.bf16 %v2403_v35, %v2402_v27  ;;  %v2413_v35 = vand.u32 4294901760, %v1708_v42  ;;  %v2414_v27 = vand.u32 4294901760, %v1713_v10 }
  0x39   :  { %1279 = vmatprep.subr.bf16.mxu0 %v2025_v18  ;;  %1347 = vmatprep.subr.bf16.mxu1 %v1653_v63  ;;  %v2087_v19 = vpack.c.bf16 %v2405_v14, %v2404_v59  ;;  %v2416_v59 = vand.u32 4294901760, %v1724_v43  ;;  %v2417_v14 = vand.u32 4294901760, %v1738_v55 }
  0x3a   :  { %v2069_v49 = vpack.c.bf16 %v2399_v16, %v2398_v17  ;;  %v2407_v17 = vand.u32 4294901760, %v1651_v62  ;;  %v2408_v16 = vand.u32 4294901760, %v1664_v3  ;;  %v2105_v7 = vpack.c.bf16 %v2414_v27, %v2413_v35 }
  0x3b   :  { %2406 = vst [vmem:[#allocation9_spill] sm:$0xff] %v2087_v19  ;;  %v2111_v53 = vpack.c.bf16 %v2417_v14, %v2416_v59  ;;  %v2425_v35 = vand.u32 4294901760, %v1845_v52  ;;  %v2426_v27 = vand.u32 4294901760, %v1863_v38  ;;  %v2428_v59 = vand.u32 4294901760, %v1883_v29 }
  0x3c   :  { %1281 = vmatpush3.bf16.msra.mxu0 %v2027_v33  ;;  %v2093_v45 = vpack.c.bf16 %v2408_v16, %v2407_v17  ;;  %2415 = vst [vmem:[#allocation12_spill] sm:$0xff] %v2105_v7  ;;  %v2419_v17 = vand.u32 4294901760, %v1801_v41  ;;  %v2420_v16 = vand.u32 4294901760, %v1806_v15  ;;  %v2429_v14 = vand.u32 4294901760, %v1888_v50 }
  0x3d   :  { %1315 = vmatprep.subr.bf16.mxu0 %v1314_v5  ;;  %v2410_v5 = vand.u32 4294901760, %v1678_v31  ;;  %2418 = vst [vmem:[#allocation13_spill] sm:$0xff] %v2111_v53  ;;  %v2129_v0 = vpack.c.bf16 %v2426_v27, %v2425_v35  ;;  %v2437_v35 = vand.u32 4294901760, %v1986_v56  ;;  %v2438_v27 = vand.u32 4294901760, %v1991_v40 }
  0x3e   :  { %2409 = vst [vmem:[#allocation10_spill] sm:$0xff] %v2093_v45  ;;  %v2117_v12 = vpack.c.bf16 %v2420_v16, %v2419_v17  ;;  %v2135_v37 = vpack.c.bf16 %v2429_v14, %v2428_v59  ;;  %v2431_v17 = vand.u32 4294901760, %v1941_v57  ;;  %v2432_v16 = vand.u32 4294901760, %v1944_v6 }
  0x3f   :  { %v2099_v61 = vpack.c.bf16 %v2411_v54, %v2410_v5  ;;  %v2422_v5 = vand.u32 4294901760, %v1823_v46  ;;  %v2423_v54 = vand.u32 4294901760, %v1839_v13  ;;  %2427 = vst [vmem:[#allocation16_spill] sm:$0xff] %v2129_v0  ;;  %v2153_v0 = vpack.c.bf16 %v2438_v27, %v2437_v35 }
  0x40   :  { %2421 = vst [vmem:[#allocation14_spill] sm:$0xff] %v2117_v12  ;;  %2430 = vst [vmem:[#allocation17_spill] sm:$0xff] %v2135_v37  ;;  %v2141_v12 = vpack.c.bf16 %v2432_v16, %v2431_v17  ;;  %v2155_v59 = vpack.c.bf16 %v302_v47, %v295_v23  ;;  %v14_v14 = vlaneseq }
  0x41   :  { %2412 = vst [vmem:[#allocation11_spill] sm:$0xff] %v2099_v61  ;;  %v2123_v60 = vpack.c.bf16 %v2423_v54, %v2422_v5  ;;  %v2434_v5 = vand.u32 4294901760, %v1952_v48  ;;  %v2435_v54 = vand.u32 4294901760, %v1963_v1  ;;  %2439 = vst [vmem:[#allocation20_spill] sm:$0xff] %v2153_v0  ;;  %v2443_v0 = vmov 1.0  }
  0x42   :  { %2433 = vst [vmem:[#allocation18_spill] sm:$0xff] %v2141_v12  ;;  %2440 = vst [vmem:[#allocation21_spill] sm:$0xff] %v2155_v59  ;;  %v2157_v37 = vand.u32 127, %v14_v14 }
  0x43   :  { %2424 = vst [vmem:[#allocation15_spill] sm:$0xff] %v2123_v60  ;;  %v2147_v60 = vpack.c.bf16 %v2435_v54, %v2434_v5  ;;  %v1474_v5 = vmov 0.0   ;;  %v2386_v54 = vmov 1.0  }
  0x44   :  { %2441 = vst [vmem:[#allocation22_spill] sm:$0xff] %v2157_v37  ;;  %v2160_v17 = vadd.s32 128, %v2157_v37 }
  0x45   :  { %2436 = vst [vmem:[#allocation19_spill] sm:$0xff] %v2147_v60 }
  0x81   :  { %v2162_v16 = vpop.permute.xlu0 %18 }
  0x82   :  { %vm23_vm0 = vcmp.eq.s32.totalorder %v2157_v37, %v2162_v16  ;;  %vm24_vm1 = vcmp.eq.s32.totalorder %v2160_v17, %v2162_v16 }
  0x83   :  { %v1006_v23 = vsel %vm23_vm0, 1.0, %v1474_v5  ;;  %v1007_v47 = vsel %vm24_vm1, 1.0, %v1474_v5  ;;  %1010 = vmatprep.mubr.msk.f32.mxu1 %vm24_vm1, %v2386_v54 }
  0x84   :  { %v164_v35 = vsub.f32 %v1007_v47, %v1007_v47  ;;  %v2178_v27 = vsub.f32 %v1006_v23, %v1006_v23  ;;  %1011 = vmatmul.mubr.msk.f32.vlgmr.msra.gmra.mrb[0].mxu1 %vm23_vm0, %v2386_v54 }
  0x85   :  { %1349 = vmatpush3.bf16.msra.mxu1 %v1671_v4  ;;  %v2185_v14 = vpop.permute.xlu0 %21 }
  0x86   :  { %2442 = vst [vmem:[#allocation23_spill] sm:$0xff] %v2185_v14  ;;  %vm25_vm2 = vcmp.eq.s32.totalorder %v2157_v37, %v2185_v14  ;;  %vm26_vm3 = vcmp.eq.s32.totalorder %v2160_v17, %v2185_v14  ;;  %1351 = vmatprep.subr.bf16.mxu1 %v1698_v9  ;;  %v165_v47 = vand.u32 4294901760, %v164_v35  ;;  %v171_v23 = vand.u32 4294901760, %v2178_v27 }
  0x87   :  { %v1008_v59 = vsel %vm25_vm2, 1.0, %v1474_v5  ;;  %v1009_v54 = vsel %vm26_vm3, 1.0, %v1474_v5  ;;  %1012 = vmatprep.mubr.msk.f32.mxu1 %vm26_vm3, %v2443_v0  ;;  %v2444_v14 = vpack.c.bf16 %v1561_v21, %v1556_v20  ;;  %v2449_v20 = vpack.c.bf16 %v1664_v3, %v1651_v62  ;;  %v2450_v21 = vld [vmem:[#allocation7_spill] sm:$0xff] }
  0x88   :  { %v179_v60 = vsub.f32 %v1009_v54, %v1009_v54  ;;  %v185_v12 = vsub.f32 %v1008_v59, %v1008_v59  ;;  %1013 = vmatmul.mubr.msk.f32.gmra.mrb[2].mxu1 %vm25_vm2, %v2443_v0  ;;  %v166_v53 = vsub.f32 %v164_v35, %v165_v47  ;;  %v172_v7 = vsub.f32 %v2178_v27, %v171_v23 }
  0x89   :  { %1353 = vmatpush3.bf16.msra.mxu1 %v1760_v11  ;;  %679 = vmatprep.mubr.f32.mxu1 %v165_v47  ;;  %v2456_v62 = vpack.c.bf16 %v1839_v13, %v1823_v46  ;;  %v2457_v3 = vpack.c.bf16 %v1863_v38, %v1845_v52  ;;  %v2460_v38 = vpack.c.bf16 %v1963_v1, %v1952_v48  ;;  %v2475_v13 = vld [vmem:[#allocation19_spill] sm:$0xff]  ;;  %v2476_v52 = vld [vmem:[#allocation20_spill] sm:$0xff] }
  0x8a   :  { %1355 = vmatprep.subr.bf16.mxu1 %v1791_v2  ;;  %v167_v5 = vand.u32 4294901760, %v166_v53  ;;  %v173_v61 = vand.u32 4294901760, %v172_v7  ;;  %v180_v45 = vand.u32 4294901760, %v179_v60  ;;  %v186_v19 = vand.u32 4294901760, %v185_v12  ;;  %v2446_v7 = vld [vmem:[#allocation5_spill] sm:$0xff] }
  0x8b   :  { %v2445_v53 = vpack.c.bf16 %v1573_v25, %v1568_v24  ;;  %v2451_v24 = vpack.c.bf16 %v1691_v8, %v1678_v31  ;;  %v2452_v25 = vld [vmem:[#allocation8_spill] sm:$0xff]  ;;  %v2458_v31 = vpack.c.bf16 %v1888_v50, %v1883_v29  ;;  %v2459_v8 = vpack.c.bf16 %v1944_v6, %v1941_v57 }
  0x8c   :  { %168 = vmatprep.mubr.f32.mxu0 %v167_v5  ;;  %v181_v54 = vsub.f32 %v179_v60, %v180_v45  ;;  %v187_v59 = vsub.f32 %v185_v12, %v186_v19  ;;  %v2447_v5 = vpack.c.bf16 %v1586_v30, %v1578_v26  ;;  %v2454_v26 = vpack.c.bf16 %v1738_v55, %v1724_v43  ;;  %v2467_v43 = vld [vmem:[#allocation13_spill] sm:$0xff]  ;;  %v2468_v55 = vld [vmem:[#allocation14_spill] sm:$0xff] }
  0x8d   :  { %1357 = vmatpush3.bf16.msra.mxu1 %v1815_v58  ;;  %174 = vmatmul.mubr.f32.vlgmr.msra.gmra.mrb[0].mxu0 %v173_v61  ;;  %v2448_v61 = vld [vmem:[#allocation6_spill] sm:$0xff]  ;;  %v2455_v30 = vpack.c.bf16 %v1806_v15, %v1801_v41  ;;  %v2461_v29 = vpack.c.bf16 %v1991_v40, %v1986_v56  ;;  %v2471_v41 = vld [vmem:[#allocation17_spill] sm:$0xff] }
  0x8e   :  { %1317 = vmatpush3.bf16.msra.mxu0 %v2444_v14  ;;  %1359 = vmatprep.subr.bf16.mxu1 %v1851_v51  ;;  %v182_v37 = vand.u32 4294901760, %v181_v54  ;;  %v188_v47 = vand.u32 4294901760, %v187_v59  ;;  %v2472_v15 = vld [vmem:[#allocation18_spill] sm:$0xff] }
  0x8f   :  { %1319 = vmatprep.subr.bf16.mxu0 %v2445_v53 }
  0x90   :  { %183 = vmatprep.mubr.f32.mxu0 %v182_v37  ;;  %v2453_v37 = vpack.c.bf16 %v1713_v10, %v1708_v42  ;;  %v2465_v42 = vld [vmem:[#allocation11_spill] sm:$0xff]  ;;  %v2466_v10 = vld [vmem:[#allocation12_spill] sm:$0xff] }
  0x91   :  { %1361 = vmatpush3.bf16.msra.mxu1 %v2446_v7  ;;  %189 = vmatmul.mubr.f32.gmra.mrb[2].mxu0 %v188_v47 }
  0x92   :  { %1321 = vmatpush3.bf16.msra.mxu0 %v2447_v5  ;;  %563 = vmatprep.mubr.f32.mxu0 %v164_v35 }
  0x93   :  { %1363 = vmatprep.subr.bf16.mxu1 %v2448_v61  ;;  %1323 = vmatprep.subr.bf16.mxu0 %v2449_v20 }
  0x95   :  { %1365 = vmatpush3.bf16.msra.mxu1 %v2450_v21 }
  0x96   :  { %1325 = vmatpush3.bf16.msra.mxu0 %v2451_v24  ;;  %1367 = vmatprep.subr.bf16.mxu1 %v2452_v25 }
  0x97   :  { %1327 = vmatprep.subr.bf16.mxu0 %v2453_v37 }
  0x99   :  { %1369 = vmatpush3.bf16.msra.mxu1 %v2010_v34 }
  0x9a   :  { %1329 = vmatpush3.bf16.msra.mxu0 %v2454_v26  ;;  %1371 = vmatprep.subr.bf16.mxu1 %v2018_v36 }
  0x9b   :  { %1331 = vmatprep.subr.bf16.mxu0 %v2455_v30 }
  0x9d   :  { %1373 = vmatpush3.bf16.msra.mxu1 %v2023_v28 }
  0x9e   :  { %1333 = vmatpush3.bf16.msra.mxu0 %v2456_v62  ;;  %1375 = vmatprep.subr.bf16.mxu1 %v2025_v18 }
  0x9f   :  { %1335 = vmatprep.subr.bf16.mxu0 %v2457_v3 }
  0xa1   :  { %1377 = vmatpush3.bf16.msra.mxu1 %v2027_v33 }
  0xa2   :  { %1337 = vmatpush3.bf16.msra.mxu0 %v2458_v31  ;;  %1411 = vmatprep.subr.bf16.mxu1 %v1653_v63  ;;  %v2462_v63 = vpack.c.bf16 %v2001_v39, %v1999_v32 }
  0xa3   :  { %1339 = vmatprep.subr.bf16.mxu0 %v2459_v8 }
  0xa4   :  { %683 = vmatmul.mubr.f32.vlgmr.msra.gmra.mrb[4].mxu1 %v171_v23 }
  0xa5   :  { %690 = vmatprep.mubr.f32.mxu1 %v180_v45  ;;  %1413 = vmatpush3.bf16.msra.mxu1 %v1671_v4  ;;  %v2463_v4 = vld [vmem:[#allocation9_spill] sm:$0xff] }
  0xa6   :  { %1341 = vmatpush3.bf16.msra.mxu0 %v2460_v38  ;;  %1415 = vmatprep.subr.bf16.mxu1 %v1698_v9  ;;  %v2464_v9 = vld [vmem:[#allocation10_spill] sm:$0xff] }
  0xa7   :  { %1343 = vmatprep.subr.bf16.mxu0 %v2461_v29 }
  0xa8   :  { %694 = vmatmul.mubr.f32.gmra.mrb[6].mxu1 %v186_v19 }
  0xa9   :  { %1417 = vmatpush3.bf16.msra.mxu1 %v1760_v11  ;;  %1018 = vmatprep.mubr.msk.f32.mxu1 %vm24_vm1, %v2443_v0  ;;  %v2469_v11 = vld [vmem:[#allocation15_spill] sm:$0xff] }
  0xaa   :  { %1345 = vmatpush3.bf16.msra.mxu0 %v2462_v63  ;;  %1419 = vmatprep.subr.bf16.mxu1 %v1791_v2  ;;  %v2470_v2 = vld [vmem:[#allocation16_spill] sm:$0xff] }
  0xab   :  { %1379 = vmatprep.subr.bf16.mxu0 %v2069_v49 }
  0xad   :  { %566 = vmatmul.mubr.f32.vlgmr.msra.gmra.mrb[4].mxu0 %v2178_v27  ;;  %1421 = vmatpush3.bf16.msra.mxu1 %v1815_v58 }
  0xae   :  { %572 = vmatprep.mubr.f32.mxu0 %v179_v60  ;;  %1381 = vmatpush3.bf16.msra.mxu0 %v2075_v44 }
  0xaf   :  { %1423 = vmatprep.subr.bf16.mxu1 %v1851_v51  ;;  %1383 = vmatprep.subr.bf16.mxu0 %v2081_v22  ;;  %v2477_v51 = vld [vmem:[#allocation21_spill] sm:$0xff] }
  0xb1   :  { %575 = vmatmul.mubr.f32.gmra.mrb[6].mxu0 %v185_v12  ;;  %1425 = vmatpush3.bf16.msra.mxu1 %v2446_v7 }
  0xb2   :  { %1385 = vmatpush3.bf16.msra.mxu0 %v2463_v4  ;;  %1014 = vmatprep.mubr.msk.f32.mxu0 %vm24_vm1, %v2443_v0 }
  0xb3   :  { %1427 = vmatprep.subr.bf16.mxu1 %v2448_v61  ;;  %1387 = vmatprep.subr.bf16.mxu0 %v2464_v9 }
  0xb5   :  { %1429 = vmatpush3.bf16.msra.mxu1 %v2450_v21 }
  0xb6   :  { %1389 = vmatpush3.bf16.msra.mxu0 %v2465_v42  ;;  %1431 = vmatprep.subr.bf16.mxu1 %v2452_v25 }
  0xb7   :  { %1391 = vmatprep.subr.bf16.mxu0 %v2466_v10 }
  0xb9   :  { %1433 = vmatpush3.bf16.msra.mxu1 %v2010_v34 }
  0xba   :  { %1393 = vmatpush3.bf16.msra.mxu0 %v2467_v43  ;;  %1435 = vmatprep.subr.bf16.mxu1 %v2018_v36 }
  0xbb   :  { %1395 = vmatprep.subr.bf16.mxu0 %v2468_v55 }
  0xbd   :  { %1437 = vmatpush3.bf16.msra.mxu1 %v2023_v28 }
  0xbe   :  { %1397 = vmatpush3.bf16.msra.mxu0 %v2469_v11  ;;  %1439 = vmatprep.subr.bf16.mxu1 %v2025_v18 }
  0xbf   :  { %1399 = vmatprep.subr.bf16.mxu0 %v2470_v2 }
  0xc1   :  { %1441 = vmatpush3.bf16.msra.mxu1 %v2027_v33 }
  0xc2   :  { %1401 = vmatpush3.bf16.msra.mxu0 %v2471_v41 }
  0xc3   :  { %1403 = vmatprep.subr.bf16.mxu0 %v2472_v15 }
  0xc4   :  { %1019 = vmatmul.mubr.msk.f32.vlgmr.msra.gmra.mrb[8].mxu1 %vm23_vm0, %v2443_v0 }
  0xc5   :  { %1020 = vmatprep.mubr.msk.f32.mxu1 %vm26_vm3, %v2443_v0 }
  0xc6   :  { %1405 = vmatpush3.bf16.msra.mxu0 %v2475_v13 }
  0xc7   :  { %1407 = vmatprep.subr.bf16.mxu0 %v2476_v52 }
  0xc8   :  { %1021 = vmatmul.mubr.msk.f32.gmra.mrb[10].mxu1 %vm25_vm2, %v2443_v0 }
  0xca   :  { %1409 = vmatpush3.bf16.msra.mxu0 %v2477_v51 }
  0xcd   :  { %1015 = vmatmul.mubr.msk.f32.vlgmr.msra.gmra.mrb[8].mxu0 %vm23_vm0, %v2443_v0 }
  0xce   :  { %1016 = vmatprep.mubr.msk.f32.mxu0 %vm26_vm3, %v2443_v0 }
  0xd1   :  { %1017 = vmatmul.mubr.msk.f32.gmra.mrb[10].mxu0 %vm25_vm2, %v2443_v0 }
 0x157   :  { %v1092_v50 = vpop.f32.mrb[0].mxu1 }
 0x158   :  { %v1093_v48 = vpop.f32.mrb[1].mxu1 }
 0x159   :  { %v1094_v32 = vadd.f32 %v1093_v48, %v1092_v50 }
 0x15b   :  { %v1095_v57 = vpop.f32.mrb[2].mxu1 }
 0x15c   :  { %v1096_v6 = vpop.f32.mrb[3].mxu1 }
 0x15d   :  { %v1097_v1 = vadd.f32 %v1096_v6, %v1095_v57 }
 0x160   :  { %v1054_v39 = vpop.f32.mrb[0].mxu0 }
 0x161   :  { %v1055_v34 = vpop.f32.mrb[1].mxu0 }
 0x162   :  { %v1056_v56 = vadd.f32 %v1055_v34, %v1054_v39 }
 0x164   :  { %v423_v40 = vadd.f32 %v1094_v32, %v1056_v56  ;;  %v1057_v33 = vpop.f32.mrb[2].mxu0 }
 0x165   :  { %v1058_v18 = vpop.f32.mrb[3].mxu0 }
 0x166   :  { %v1059_v36 = vadd.f32 %v1058_v18, %v1057_v33 }
 0x168   :  { %v430_v28 = vadd.f32 %v1097_v1, %v1059_v36 }
 0x177   :  { %v1168_v60 = vpop.f32.mrb[4].mxu1 }
 0x178   :  { %v1169_v12 = vpop.f32.mrb[5].mxu1 }
 0x179   :  { %v1170_v45 = vadd.f32 %v1169_v12, %v1168_v60 }
 0x17b   :  { %v1171_v22 = vpop.f32.mrb[6].mxu1 }
 0x17c   :  { %v1172_v44 = vpop.f32.mrb[7].mxu1 }
 0x17d   :  { %v1173_v0 = vadd.f32 %v1172_v44, %v1171_v22 }
 0x180   :  { %v1130_v49 = vpop.f32.mrb[4].mxu0 }
 0x181   :  { %v1131_v19 = vpop.f32.mrb[5].mxu0 }
 0x182   :  { %v1132_v17 = vadd.f32 %v1131_v19, %v1130_v49 }
 0x184   :  { %v568_v16 = vadd.f32 %v1132_v17, %v423_v40  ;;  %v1133_v35 = vpop.f32.mrb[6].mxu0 }
 0x185   :  { %v1134_v27 = vpop.f32.mrb[7].mxu0 }
 0x186   :  { %v1135_v14 = vadd.f32 %v1134_v27, %v1133_v35  ;;  %v685_v23 = vadd.f32 %v1170_v45, %v568_v16 }
 0x188   :  { %v577_v54 = vadd.f32 %v1135_v14, %v430_v28 }
 0x18a   :  { %v696_v59 = vadd.f32 %v1173_v0, %v577_v54 }
 0x197   :  { %v1244_v47 = vpop.f32.mrb[8].mxu1 }
 0x198   :  { %v1245_v53 = vpop.f32.mrb[9].mxu1 }
 0x199   :  { %v1246_v7 = vadd.f32 %v1245_v53, %v1244_v47 }
 0x19b   :  { %v1247_v5 = vpop.f32.mrb[10].mxu1 }
 0x19c   :  { %v1248_v61 = vpop.f32.mrb[11].mxu1 }
 0x19d   :  { %v1249_v20 = vadd.f32 %v1248_v61, %v1247_v5 }
 0x1a0   :  { %v1206_v21 = vpop.f32.mrb[8].mxu0 }
 0x1a1   :  { %v1207_v24 = vpop.f32.mrb[9].mxu0 }
 0x1a2   :  { %v1208_v25 = vadd.f32 %v1207_v24, %v1206_v21 }
 0x1a4   :  { %v864_v37 = vadd.f32 %v1208_v25, %v685_v23  ;;  %v1209_v26 = vpop.f32.mrb[10].mxu0 }
 0x1a5   :  { %v1210_v30 = vpop.f32.mrb[11].mxu0 }
 0x1a6   :  { %v975_v62 = vadd.f32 %v1246_v7, %v864_v37  ;;  %v1211_v3 = vadd.f32 %v1210_v30, %v1209_v26 }
 0x1a8   :  { %v985_v31 = vmax.f32 %v975_v62, 0.0  ;;  %v871_v8 = vadd.f32 %v1211_v3, %v696_v59 }
 0x1aa   :  { %988 = vst.msk [vmem:[#allocation2] sm:$0xff] %vm987_vm4, %v985_v31  ;;  %v982_v38 = vadd.f32 %v1249_v20, %v871_v8 }
 0x1ac   :  { %v986_v29 = vmax.f32 %v982_v38, 0.0 }
 0x1ae   :  { %989 = vst.msk [vmem:[#allocation2 + $0x8] sm:$0xff] %vm987_vm4, %v986_v29 }
 0x1af   :  { %1460 = shalt.err (!%p1457_p4)
}
 0x1b0   :  { %s1461_s23 = scalar_lea.hbm %s2345_s2, 256 }
 0x1b1   :  { %p1462_p5 = scmp.ne.s32.totalorder %s2345_s2, %s1461_s23  ;;  %p1465_p6 = scmp.lt.u32.totalorder %s1461_s23, %s2345_s2 }
 0x1b3   :  { %p1467_p7 = pnand %p1465_p6, %p1462_p5 }
 0x1b5   :  { %1470 = shalt.err (!%p1467_p7)
}
 0x1b6   :  { %s1477_s28 = smov 128   ;;  %s1478_s0 = smov 8  }
 0x1b7   :  { %1001 = dma.vmem_to_hbm [thread:$0]  %s996_s19, 256, %s2345_s2, [#allocation3], %s1477_s28, %s1477_s28, %s1478_s0  }
 0x1b8   :  { %1471 = dma.done.wait [#allocation3], 256  }
 0x1b9   :  { %1472 = vsyncadd [#allocation3], 4294967040 }
 0x1ba   :  { %1005 = vsyncpa [#allocation3], 1 }

</bundles_post_ra>
